<compile_context>
chip_gen: v5e
topology: v5e:2x2
jax: 0.10.0
libtpu: 0.0.40
codegen_flags: <defaults>
</compile_context>

<pallas_src>
import functools

import jax
import jax.numpy as jnp
from jax.experimental import pallas as pl
from jax.experimental.pallas import tpu as pltpu


def _round_up(x, m):
    return ((x + m - 1) // m) * m


def _cond_mlp_kernel(cls_ref, w1_ref, b1_ref, w2_ref, b2_ref, out_ref):
    """out = relu(cls @ W1 + b1) @ W2 + b2 on one (tb, H) batch tile (f32)."""
    h = jnp.dot(cls_ref[...], w1_ref[...], preferred_element_type=jnp.float32)
    h = jnp.maximum(h + b1_ref[...], 0.0)                       # (tb, d_cond)
    o = jnp.dot(h, w2_ref[...], preferred_element_type=jnp.float32)
    out_ref[...] = (o + b2_ref[...]).astype(out_ref.dtype)


@functools.partial(jax.jit, static_argnames=("out_dtype",))
def bert_conditioning_forward(last_hidden_state, w1, b1, w2, b2,
                              out_dtype=jnp.float32):
    """last_hidden_state: (B, S, H) f32 -> cond: (B, d_cond) out_dtype."""
    B, S, H = last_hidden_state.shape
    H_in, d_cond = w1.shape
    assert H_in == H

    # [CLS] selection: only B*H elements are read; the (B, S, H) tensor is
    # never DMA'd by the kernel.  No padding / casting copies follow.
    cls = last_hidden_state[:, 0, :].astype(jnp.float32)         # (B, H)
    b1_2d = b1.reshape(1, d_cond).astype(jnp.float32)
    b2_2d = b2.reshape(1, d_cond).astype(jnp.float32)

    # Batch tiling: per-grid-step overhead (~0.35 us) dwarfs the MXU work at
    # these sizes, so use one block for the whole batch.  Only for large B
    # split into exactly 2 sublane-aligned blocks so v7x's second TensorCore
    # can shard the "parallel" axis (a cheap 2-step loop on v5e/v6e).
    if B >= 256:
        tb = _round_up(pl.cdiv(B, 2), 8)
    else:
        tb = B
    grid = (pl.cdiv(B, tb),)

    out_bytes = jnp.dtype(out_dtype).itemsize
    flops = 2 * B * (H * d_cond + d_cond * d_cond)
    bytes_accessed = (4 * (B * H + H * d_cond + d_cond * d_cond + 2 * d_cond)
                      + B * d_cond * out_bytes)

    return pl.pallas_call(
        _cond_mlp_kernel,
        out_shape=jax.ShapeDtypeStruct((B, d_cond), out_dtype),
        grid_spec=pl.GridSpec(
            grid=grid,
            in_specs=[
                pl.BlockSpec((tb, H), lambda i: (i, 0)),            # CLS tile
                pl.BlockSpec((H, d_cond), lambda i: (0, 0)),        # W1 (resident)
                pl.BlockSpec((1, d_cond), lambda i: (0, 0)),        # b1 (resident)
                pl.BlockSpec((d_cond, d_cond), lambda i: (0, 0)),   # W2 (resident)
                pl.BlockSpec((1, d_cond), lambda i: (0, 0)),        # b2 (resident)
            ],
            out_specs=pl.BlockSpec((tb, d_cond), lambda i: (i, 0)),
        ),
        compiler_params=pltpu.CompilerParams(
            dimension_semantics=("parallel",),
        ),
        cost_estimate=pl.CostEstimate(
            flops=flops, transcendentals=0, bytes_accessed=bytes_accessed),
    )(cls, w1, b1_2d, w2, b2_2d)


def _reference(last_hidden_state, w1, b1, w2, b2):
    cls = last_hidden_state[:, 0, :]
    h = jnp.maximum(cls @ w1 + b1, 0.0)
    return h @ w2 + b2


if __name__ == "__main__":
    # Small shapes consistent with the module's forward:
    #   B = batch of text descriptions, S = padded token length,
    #   H_bert = bert hidden size (small stand-in), d_cond = conditioning dim.
    B, S, H_bert, d_cond = 2, 8, 32, 32

    key = jax.random.PRNGKey(0)
    k_hid, k_w1, k_b1, k_w2, k_b2 = jax.random.split(key, 5)

    # Synthetic stand-in for bert(**tokens).last_hidden_state.
    last_hidden_state = jax.random.normal(k_hid, (B, S, H_bert), dtype=jnp.float32)

    # Deterministic MLP params (nn.Linear(H_bert, d_cond), nn.Linear(d_cond, d_cond)),
    # stored as (in_dim, out_dim) so the kernel computes x @ W + b.
    w1 = jax.random.normal(k_w1, (H_bert, d_cond), dtype=jnp.float32) * 0.05
    b1 = jax.random.normal(k_b1, (d_cond,), dtype=jnp.float32) * 0.05
    w2 = jax.random.normal(k_w2, (d_cond, d_cond), dtype=jnp.float32) * 0.05
    b2 = jax.random.normal(k_b2, (d_cond,), dtype=jnp.float32) * 0.05

    # Small-batch path: grid=(1,), whole batch in one block, no padding.
    cond = jax.block_until_ready(
        bert_conditioning_forward(last_hidden_state, w1, b1, w2, b2))
    ref = _reference(last_hidden_state, w1, b1, w2, b2)
    assert cond.shape == (B, d_cond)
    assert jnp.allclose(cond, ref, atol=5e-3, rtol=5e-3), \
        "Pallas kernel mismatch vs reference (small batch)"

    # Large-batch path: 2 "parallel" batch blocks (second TensorCore on v7x;
    # plain 2-step grid on v5e/v6e), weights resident across steps.
    B2 = 256
    lhs2 = jax.random.normal(jax.random.PRNGKey(1), (B2, S, H_bert),
                             dtype=jnp.float32)
    cond2 = jax.block_until_ready(
        bert_conditioning_forward(lhs2, w1, b1, w2, b2))
    ref2 = _reference(lhs2, w1, b1, w2, b2)
    assert cond2.shape == (B2, d_cond)
    assert jnp.allclose(cond2, ref2, atol=5e-3, rtol=5e-3), \
        "Pallas kernel mismatch vs reference (large batch)"

    print("KERNEL_OK")
</pallas_src>

<mosaic_0001>
module attributes {stable_mosaic.version = 11 : i64} {
  func.func @_cond_mlp_kernel(%arg0: i32, %arg1: memref<2x32xf32, #tpu.memory_space<vmem>>, %arg2: memref<32x32xf32, #tpu.memory_space<vmem>>, %arg3: memref<1x32xf32, #tpu.memory_space<vmem>>, %arg4: memref<32x32xf32, #tpu.memory_space<vmem>>, %arg5: memref<1x32xf32, #tpu.memory_space<vmem>>, %arg6: memref<2x32xf32, #tpu.memory_space<vmem>>) attributes {dimension_semantics = [#tpu.dimension_semantics<parallel>], iteration_bounds = array<i64: 1>, scalar_prefetch = 0 : i64, scratch_operands = 0 : i64, tpu.core_type = #tpu.core_type<tc>, window_params = [{transform_indices = @transform_0, window_bounds = array<i64: 2, 32>}, {pipeline_mode = #tpu.pipeline_mode<synchronous>, transform_indices = @transform_1, window_bounds = array<i64: 32, 32>}, {pipeline_mode = #tpu.pipeline_mode<synchronous>, transform_indices = @transform_2, window_bounds = array<i64: 1, 32>}, {pipeline_mode = #tpu.pipeline_mode<synchronous>, transform_indices = @transform_3, window_bounds = array<i64: 32, 32>}, {pipeline_mode = #tpu.pipeline_mode<synchronous>, transform_indices = @transform_4, window_bounds = array<i64: 1, 32>}, {transform_indices = @transform_5, window_bounds = array<i64: 2, 32>}]} {
    %c0 = arith.constant 0 : index
    %c0_0 = arith.constant 0 : index
    %0 = vector.load %arg1[%c0, %c0_0] : memref<2x32xf32, #tpu.memory_space<vmem>>, vector<2x32xf32>
    %c0_1 = arith.constant 0 : index
    %c0_2 = arith.constant 0 : index
    %1 = vector.load %arg2[%c0_1, %c0_2] : memref<32x32xf32, #tpu.memory_space<vmem>>, vector<32x32xf32>
    %cst = arith.constant dense<0.000000e+00> : vector<2x32xf32>
    %2 = tpu.matmul %0, %1, %cst {dimension_numbers = #tpu.dot_dimension_numbers<[1], [0], [0], [1], [0, 0, 1, 1], [], []>} : vector<2x32xf32>, vector<32x32xf32>, vector<2x32xf32> -> vector<2x32xf32>
    %c0_3 = arith.constant 0 : index
    %c0_4 = arith.constant 0 : index
    %3 = vector.load %arg3[%c0_3, %c0_4] : memref<1x32xf32, #tpu.memory_space<vmem>>, vector<1x32xf32>
    %4 = vector.broadcast %3 : vector<1x32xf32> to vector<2x32xf32>
    %5 = arith.addf %2, %4 : vector<2x32xf32>
    %cst_5 = arith.constant 0.000000e+00 : f32
    %6 = vector.broadcast %cst_5 : f32 to vector<2x32xf32>
    %7 = arith.maximumf %5, %6 : vector<2x32xf32>
    %c0_6 = arith.constant 0 : index
    %c0_7 = arith.constant 0 : index
    %8 = vector.load %arg4[%c0_6, %c0_7] : memref<32x32xf32, #tpu.memory_space<vmem>>, vector<32x32xf32>
    %cst_8 = arith.constant dense<0.000000e+00> : vector<2x32xf32>
    %9 = tpu.matmul %7, %8, %cst_8 {dimension_numbers = #tpu.dot_dimension_numbers<[1], [0], [0], [1], [0, 0, 1, 1], [], []>} : vector<2x32xf32>, vector<32x32xf32>, vector<2x32xf32> -> vector<2x32xf32>
    %c0_9 = arith.constant 0 : index
    %c0_10 = arith.constant 0 : index
    %10 = vector.load %arg5[%c0_9, %c0_10] : memref<1x32xf32, #tpu.memory_space<vmem>>, vector<1x32xf32>
    %11 = vector.broadcast %10 : vector<1x32xf32> to vector<2x32xf32>
    %12 = arith.addf %9, %11 : vector<2x32xf32>
    %c0_11 = arith.constant 0 : index
    %c0_12 = arith.constant 0 : index
    %13 = vector.load %arg6[%c0_11, %c0_12] : memref<2x32xf32, #tpu.memory_space<vmem>>, vector<2x32xf32>
    tpu.vector_store %arg6[%c0_11, %c0_12], %12 {strides = array<i32>} : memref<2x32xf32, #tpu.memory_space<vmem>>, vector<2x32xf32>,
    return
  }
  func.func @transform_0(%arg0: i32) -> (i32, i32) {
    %c0_i32 = arith.constant 0 : i32
    %c0_i32_0 = arith.constant 0 : i32
    return %arg0, %c0_i32 : i32, i32
  }
  func.func @transform_1(%arg0: i32) -> (i32, i32) {
    %c0_i32 = arith.constant 0 : i32
    %c0_i32_0 = arith.constant 0 : i32
    %c0_i32_1 = arith.constant 0 : i32
    return %c0_i32, %c0_i32_0 : i32, i32
  }
  func.func @transform_2(%arg0: i32) -> (i32, i32) {
    %c0_i32 = arith.constant 0 : i32
    %c0_i32_0 = arith.constant 0 : i32
    %c0_i32_1 = arith.constant 0 : i32
    return %c0_i32, %c0_i32_0 : i32, i32
  }
  func.func @transform_3(%arg0: i32) -> (i32, i32) {
    %c0_i32 = arith.constant 0 : i32
    %c0_i32_0 = arith.constant 0 : i32
    %c0_i32_1 = arith.constant 0 : i32
    return %c0_i32, %c0_i32_0 : i32, i32
  }
  func.func @transform_4(%arg0: i32) -> (i32, i32) {
    %c0_i32 = arith.constant 0 : i32
    %c0_i32_0 = arith.constant 0 : i32
    %c0_i32_1 = arith.constant 0 : i32
    return %c0_i32, %c0_i32_0 : i32, i32
  }
  func.func @transform_5(%arg0: i32) -> (i32, i32) {
    %c0_i32 = arith.constant 0 : i32
    %c0_i32_0 = arith.constant 0 : i32
    return %arg0, %c0_i32 : i32, i32
  }
}

</mosaic_0001>

<bundles_post_ra>
// kernel: bert_conditioning_forward.1
= control target key start
LH: loop header
LB: loop body
LE: loop exit
PB: predicated region body
PF: predicated region fallthrough
CT: control target
= control target key end

     0   :  { %10 = vsyncpa [#allocation3], 0  ;;  %s278_s0 = inlined_call_operand.vmem [shape: f32[2,32], index: 0, kind: input, shape index: {}]   ;;  %s279_s1 = inlined_call_operand.hbm [shape: f32[32,32], index: 1, kind: input, shape index: {}]   ;;  %s280_s2 = inlined_call_operand.vmem [shape: f32[1,32], index: 2, kind: input, shape index: {}]   ;;  %s281_s3 = inlined_call_operand.hbm [shape: f32[32,32], index: 3, kind: input, shape index: {}]   ;;  %s282_s4 = inlined_call_operand.vmem [shape: f32[1,32], index: 4, kind: input, shape index: {}]   ;;  %s283_s5 = inlined_call_operand.hbm [shape: f32[2,32], index: 5, kind: output, shape index: {}]  }
   0x1   :  { %11 = vsyncpa [#allocation6], 0 }
   0x2   :  { %12 = vsyncpa [#allocation4], 0  ;;  %s19_s20 = sshll.u32 %s279_s1, 4  ;;  %s225_s21 = smov [#allocation2]   ;;  %s20_s20 = int_to_ptr.hbm [resolvable:$true] %s19_s20 }
   0x3   :  { %s21_s22 = sshll.u32 %s225_s21, 4  ;;  %s34_s25 = sshll.u32 %s281_s3, 4  ;;  %s22_s22 = int_to_ptr.vmem [resolvable:$true] %s21_s22  ;;  %s35_s25 = int_to_ptr.hbm [resolvable:$true] %s34_s25 }
   0x4   :  { %s226_s26 = smov 128   ;;  %s227_s27 = smov 8  }
   0x5   :  { %27 = dma.hbm_to_vmem [thread:$0]  %s20_s20, 512, %s22_s22, [#allocation3], %s226_s26, %s226_s26, %s227_s27  }
   0x6   :  { %s228_s28 = smov [#allocation5]  }
   0x7   :  { %s36_s29 = sshll.u32 %s228_s28, 4  ;;  %s37_s29 = int_to_ptr.vmem [resolvable:$true] %s36_s29 }
   0x8   :  { %42 = dma.hbm_to_vmem [thread:$0]  %s35_s25, 512, %s37_s29, [#allocation6], %s226_s26, %s226_s26, %s227_s27  }
   0x9   :  { %219 = dma.done.wait [#allocation3], 512  }
   0xa   :  { %220 = vsyncadd [#allocation3], 4294966784 }
   0xb   :  { %221 = dma.done.wait [#allocation6], 512  }
   0xc   :  { %222 = vsyncadd [#allocation6], 4294966784  ;;  %v57_v0 = vld [vmem:[#allocation2 + $0x18] sm:$0xff]  ;;  %v56_v1 = vld [vmem:[#allocation2 + $0x10] sm:$0xff]  ;;  %vm62_vm0 = vcmask 261120   ;;  %s127_s12 = sshll.u32 %s283_s5, 4  ;;  %s128_s12 = int_to_ptr.hbm [resolvable:$true] %s127_s12 }
   0xd   :  { %78 = vmatpush.msra.mxu0 %v57_v0  ;;  %v90_v2 = vld [vmem:[#allocation5 + $0x18] sm:$0xff]  ;;  %v55_v3 = vld [vmem:[#allocation2 + $0x8] sm:$0xff]  ;;  %v54_v4 = vld [vmem:[#allocation2] sm:$0xff]  ;;  %vm118_vm1 = vcmask 254976  }
   0xe   :  { %110 = vmatpush.msra.mxu1 %v90_v2  ;;  %v53_v5 = vld [vmem:[%s278_s0] sm:$0x3]  ;;  %v89_v6 = vld [vmem:[#allocation5 + $0x10] sm:$0xff]  ;;  %v88_v7 = vld [vmem:[#allocation5 + $0x8] sm:$0xff]  ;;  %s229_s0 = smov [#allocation7]  }
   0xf   :  { %79 = vmatpush.msra.mxu0 %v56_v1  ;;  %v87_v8 = vld [vmem:[#allocation5] sm:$0xff]  ;;  %s125_s9 = sshll.u32 %s229_s0, 4  ;;  %s126_s9 = int_to_ptr.vmem [resolvable:$true] %s125_s9 }
  0x10   :  { %111 = vmatpush.msra.mxu1 %v89_v6  ;;  %v145_v9 = vld [vmem:[%s280_s2] ss:$0 sm:$0xff] }
  0x11   :  { %80 = vmatpush.msra.mxu0 %v55_v3  ;;  %v146_v13 = vld [vmem:[%s282_s4] ss:$0 sm:$0xff] }
  0x12   :  { %112 = vmatpush.msra.mxu1 %v88_v7 }
  0x13   :  { %81 = vmatpush.msra.mxu0 %v54_v4 }
  0x14   :  { %138 = vmatmul.msk.f32.vlgmr.msra.gmra.mxu0 %vm62_vm0, %v53_v5  ;;  %113 = vmatpush.msra.mxu1 %v87_v8 }
  0x91   :  { %v83_v10 = vpop.f32.mrf.mxu0 }
  0x92   :  { %v84_v11 = vadd.f32 %v145_v9, %v83_v10 }
  0x94   :  { %v86_v12 = vmax.f32 %v84_v11, 0.0 }
  0x96   :  { %139 = vmatmul.msk.f32.vlgmr.msra.gmra.mxu1 %vm62_vm0, %v86_v12 }
 0x113   :  { %v115_v14 = vpop.f32.mrf.mxu1 }
 0x114   :  { %v116_v15 = vadd.f32 %v146_v13, %v115_v14 }
 0x116   :  { %119 = vst.msk [vmem:[#allocation7] sm:$0x3] %vm118_vm1, %v116_v15 }
 0x117   :  { %130 = dma.vmem_to_hbm [thread:$0]  %s126_s9, 32, %s128_s12, [#allocation4]  }
 0x118   :  { %223 = dma.done.wait [#allocation4], 32  }
 0x119   :  { %224 = vsyncadd [#allocation4], 4294967264 }
 0x11a   :  { %135 = vsyncpa [#allocation3], 1 }
 0x11b   :  { %136 = vsyncpa [#allocation6], 1 }
 0x11c   :  { %137 = vsyncpa [#allocation4], 1 }

</bundles_post_ra>
